<compile_context>
chip_gen: v7x
topology: tpu7x:2x2x1
jax: 0.10.0
libtpu: 0.0.40
codegen_flags: <defaults>
</compile_context>

<pallas_src>
from enum import Enum

import numpy as np
import jax
import jax.numpy as jnp
from jax.experimental import pallas as pl
from jax.experimental.pallas import tpu as pltpu


class ModelMode(Enum):
    classification = 1
    segmentation = 2


class ProcessMode(Enum):
    train = 1
    infer = 2


_VMEM_SPEC = pl.BlockSpec(memory_space=pltpu.MemorySpace.VMEM)


def _round_up(x, m):
    return (x + m - 1) // m * m


# ----------------------------------------------------------------------------
# Layout helpers (static / trace-time; the gathers and transposes fuse under jit)
# ----------------------------------------------------------------------------
def _pool_row_order(side_h, side_w):
    """q[h*W + w] = position of pixel (h, w) in "pyramid" order.

    Pixel rows are ordered phase-major over the 2x2-pooling pyramid so that
    inside the kernel a 2x2 average pool is the mean of four CONTIGUOUS chunks
    and a 2x nearest upsample is four stacked copies of the coarse rows.
    """
    assert side_h == side_w and side_h & (side_h - 1) == 0, (
        "synthetic encoder expects square power-of-two spatial dims")
    levels = int(np.log2(side_h))
    hh, ww = np.meshgrid(np.arange(side_h), np.arange(side_w), indexing="ij")
    q = np.zeros((side_h, side_w), dtype=np.int64)
    for lvl in range(levels):
        phase = ((hh >> lvl) & 1) * 2 + ((ww >> lvl) & 1)
        q += phase * (4 ** (levels - 1 - lvl))
    return q.reshape(-1)


def _nchw_to_t(x_nchw, c_pad):
    """(N, C, H, W) -> (C_pad, H*W*N): channels on sublanes, pyramid-ordered
    (position-major, batch-minor) pixel rows on lanes; channels zero-padded."""
    n, c, h, w = x_nchw.shape
    inv = np.argsort(_pool_row_order(h, w))              # inv[pos] = raster idx
    rows = jnp.transpose(x_nchw, (2, 3, 0, 1)).reshape(h * w, n, c)
    rows = rows[inv].reshape(h * w * n, c)
    x_t = rows.T
    if c < c_pad:
        x_t = jnp.pad(x_t, ((0, c_pad - c), (0, 0)))
    return x_t


def _rows_to_nchw(rows, n, side):
    """(S*N, C) pyramid-ordered rows -> (N, C, side, side)."""
    q = _pool_row_order(side, side)
    grid = rows.reshape(side * side, n, rows.shape[-1])[q]
    grid = grid.reshape(side, side, n, rows.shape[-1])
    return jnp.transpose(grid, (2, 3, 0, 1))


def _t_to_nchw(x_t, n, side):
    """(C, S*N) pyramid-ordered transposed rows -> (N, C, side, side)."""
    c = x_t.shape[0]
    q = _pool_row_order(side, side)
    vals = x_t.reshape(c, side * side, n)[:, q, :]
    vals = vals.reshape(c, side, side, n)
    return jnp.transpose(vals, (3, 0, 1, 2))


def _init_linear(key, c_in, c_out):
    kw, kb = jax.random.split(key)
    scale = 1.0 / jnp.sqrt(jnp.float32(c_in))
    w = jax.random.uniform(kw, (c_in, c_out), jnp.float32, -scale, scale)
    b = jax.random.uniform(kb, (1, c_out), jnp.float32, -scale, scale)
    return w, b


# ----------------------------------------------------------------------------
# Synthetic sub-models (parameter containers; execution happens in the fused
# Pallas kernel built by Pipeline)
# ----------------------------------------------------------------------------
class Encoder:
    CHANNELS = (8, 16, 32, 64, 64)

    def __init__(self, key, in_channels):
        keys = jax.random.split(key, len(self.CHANNELS))
        cins = (in_channels,) + self.CHANNELS[:-1]
        self.in_channels = in_channels
        self.params = []
        for k, ci, co in zip(keys, cins, self.CHANNELS):
            w, b = _init_linear(k, ci, co)
            self.params.append((w.astype(jnp.bfloat16), b))


class Classifier:
    def __init__(self, key, c_in, num_classes):
        w, b = _init_linear(key, c_in, num_classes)
        self.w = w.astype(jnp.bfloat16)
        self.b = b
        self.num_classes = num_classes


class Decoder:
    def __init__(self, key, enc_channels, num_classes):
        c1, c2, c3, c4, c5 = enc_channels
        keys = jax.random.split(key, 5)

        def split_init(k, c_top, c_bot, c_out):
            w, b = _init_linear(k, c_top + c_bot, c_out)
            return (w[:c_top].astype(jnp.bfloat16),
                    w[c_top:].astype(jnp.bfloat16), b)

        self.p4 = split_init(keys[0], c5, c4, 64)
        self.p3 = split_init(keys[1], 64, c3, 32)
        self.p2 = split_init(keys[2], 32, c2, 16)
        self.p1 = split_init(keys[3], 16, c1, 16)
        wo, bo = _init_linear(keys[4], 16, num_classes)
        self.pout = (wo.astype(jnp.bfloat16), bo)
        self.num_classes = num_classes


# ----------------------------------------------------------------------------
# The single fused kernel: encoder -> (cls | CAM) -> decoder, all on live values
# ----------------------------------------------------------------------------
def _build_fused_kernel(lay, n, need_cls, need_cams, need_seg):
    """lay[i] is 'T' (channels-on-sublanes, rows-on-lanes, compute W^T @ X)
    when encoder stage i's row count is a multiple of 128 (lane-dense big
    stages), else 'R' (rows-on-sublanes) for the small deep stages.  The plan
    is static, so all weights arrive pre-transposed for their stage layout."""
    n_stages = len(lay)

    def dot32(a, b):
        return jnp.dot(a.astype(jnp.bfloat16), b.astype(jnp.bfloat16),
                       preferred_element_type=jnp.float32)

    def kernel(*refs):
        it = iter(refs)
        x_ref = next(it)
        enc_p = [(next(it), next(it)) for _ in range(n_stages)]
        if need_cls or need_cams:
            wc_ref, bc_ref = next(it), next(it)
        if need_seg:
            dec_p = [(next(it), next(it), next(it)) for _ in range(n_stages - 1)]
            wo_ref, bo_ref = next(it), next(it)
        cls_ref = next(it) if need_cls else None
        cam_ref = next(it) if need_cams else None
        seg_ref = next(it) if need_seg else None

        # ---- encoder: 5 x (pool + 1x1 conv + ReLU) on live values ----------
        feats = []          # per-stage output, in layout lay[i]
        rows_form = {}      # rows-layout copy made at the single T->R flip
        h = x_ref[...]
        for i in range(n_stages):
            w_ref, b_ref = enc_p[i]
            if i == 0:
                p = h
            else:
                src = h
                if lay[i] != lay[i - 1]:        # monotonic: only T -> R happens
                    src = h.T
                    rows_form[i - 1] = src
                if lay[i] == 'T':               # pool = mean of 4 lane chunks
                    g = src.shape[1] // 4
                    p = 0.25 * (src[:, 0:g] + src[:, g:2 * g]
                                + src[:, 2 * g:3 * g] + src[:, 3 * g:4 * g])
                else:                           # pool = mean of 4 sublane chunks
                    g = src.shape[0] // 4
                    p = 0.25 * (src[0:g] + src[g:2 * g]
                                + src[2 * g:3 * g] + src[3 * g:4 * g])
            if lay[i] == 'T':                   # w_ref = W^T (c_out, c_in), bias col
                h = jnp.maximum(dot32(w_ref[...], p) + b_ref[...], 0.0)
            else:                               # w_ref = W (c_in, c_out), bias row
                h = jnp.maximum(dot32(p, w_ref[...]) + b_ref[...], 0.0)
            feats.append(h)

        # ---- classifier heads on the live x5 --------------------------------
        if need_cls or need_cams:
            x5_rows = feats[-1].T if lay[-1] == 'T' else feats[-1]
            if need_cls:
                s5 = x5_rows.shape[0] // n      # GAP = sublane reduction
                gap = x5_rows[0:n, :]
                for k in range(1, s5):
                    gap = gap + x5_rows[k * n:(k + 1) * n, :]
                gap = gap * (1.0 / s5)
                cls_ref[...] = dot32(gap, wc_ref[...]) + bc_ref[...]
            if need_cams:
                # TODO(synk): the reference classifier is not provided; ReLU on
                # the CAMs matches the synthetic definition used throughout.
                cam_ref[...] = jnp.maximum(dot32(x5_rows, wc_ref[...]), 0.0)

        # ---- decoder: split-weight concat + upsample, everything is a value -
        if need_seg:
            d = feats[-1]
            declay = lay[-1]
            for idx, j in enumerate(range(n_stages - 2, -1, -1)):
                wt_ref, wb_ref, b_ref = dec_p[idx]
                run_t = (lay[j] == 'T' and lay[j + 1] == 'T')
                if run_t:
                    if declay == 'R':
                        d = d.T
                    t = dot32(wt_ref[...], d)            # (c_out, r_coarse)
                    s = dot32(wb_ref[...], feats[j])     # (c_out, 4*r_coarse)
                    rcoarse = t.shape[1]
                    bias = b_ref[...]                    # (c_out, 1)
                    d = jnp.concatenate(
                        [jnp.maximum(
                            s[:, k * rcoarse:(k + 1) * rcoarse] + t + bias, 0.0)
                         for k in range(4)], axis=1)
                    declay = 'T'
                else:
                    if declay == 'T':
                        d = d.T
                    skip = rows_form[j] if lay[j] == 'T' else feats[j]
                    t = dot32(d, wt_ref[...])            # (r_coarse, c_out)
                    s = dot32(skip, wb_ref[...])         # (4*r_coarse, c_out)
                    g, c_out = t.shape
                    bias = b_ref[...]                    # (1, c_out)
                    d = jnp.maximum(
                        s.reshape(4, g, c_out) + t[None] + bias, 0.0
                    ).reshape(4 * g, c_out)
                    declay = 'R'
            if declay == 'R':
                d = d.T
            # lane-dense transposed seg head: (classes_pad, H*W*N), unmasked store
            seg_ref[...] = dot32(wo_ref[...], d) + bo_ref[...]

    return kernel


# ----------------------------------------------------------------------------
# Pipeline (mirrors the PyTorch module's forward dispatch), fully jitted
# ----------------------------------------------------------------------------
class Pipeline:
    def __init__(self, encoder_model, classifier_model, decoder_model):
        self.encoder_model = encoder_model
        self.classifier_model = classifier_model
        self.decoder_model = decoder_model
        self._forward = jax.jit(self._forward_impl,
                                static_argnames=("model_mode", "mode"))
        self._forward_cam = jax.jit(self._forward_cam_impl)

    # ---- one fused pallas_call for everything that is needed ----------------
    def _fused(self, x, need_cls, need_cams, need_seg):
        enc, clf, dec = self.encoder_model, self.classifier_model, self.decoder_model
        n, c_in, hgt, wid = x.shape
        n_stages = len(enc.CHANNELS)
        assert hgt == wid and hgt >= 2 ** (n_stages - 1)
        r_full = hgt * wid * n
        assert r_full % 128 == 0, "fused kernel expects N*H*W % 128 == 0"
        rc = [r_full // 4 ** i for i in range(n_stages)]       # rows per stage
        lay = tuple('T' if r % 128 == 0 else 'R' for r in rc)  # static layout plan

        c_pad = _round_up(max(c_in, 8), 8)
        x_t = _nchw_to_t(x, c_pad)

        num_classes = clf.num_classes
        k_lane = _round_up(num_classes, 128)     # lane-dense cls / CAM slab
        k_sub = _round_up(num_classes, 8)        # sublane-dense seg slab

        inputs, flops = [x_t], 0

        # encoder params (pre-transposed for 'T' stages)
        c_prev = c_pad
        for i, (w, b) in enumerate(enc.params):
            if i == 0 and w.shape[0] < c_pad:
                w = jnp.pad(w, ((0, c_pad - w.shape[0]), (0, 0)))
            if lay[i] == 'T':
                inputs += [w.T, b.T]
            else:
                inputs += [w, b]
            flops += 2 * rc[i] * c_prev * w.shape[1]
            c_prev = w.shape[1]

        if need_cls or need_cams:
            wc = jnp.pad(clf.w, ((0, 0), (0, k_lane - num_classes)))
            bc = jnp.pad(clf.b, ((0, 0), (0, k_lane - num_classes)))
            inputs += [wc, bc]
            if need_cls:
                flops += 2 * n * wc.shape[0] * k_lane
            if need_cams:
                flops += 2 * rc[-1] * wc.shape[0] * k_lane

        if need_seg:
            for idx, j in enumerate(range(n_stages - 2, -1, -1)):
                wt, wb, b = (dec.p4, dec.p3, dec.p2, dec.p1)[idx]
                if lay[j] == 'T' and lay[j + 1] == 'T':
                    inputs += [wt.T, wb.T, b.T]
                else:
                    inputs += [wt, wb, b]
                flops += 2 * rc[j + 1] * wt.shape[0] * wt.shape[1]
                flops += 2 * rc[j] * wb.shape[0] * wb.shape[1]
            wo, bo = dec.pout
            inputs += [jnp.pad(wo, ((0, 0), (0, k_sub - num_classes))).T,
                       jnp.pad(bo, ((0, 0), (0, k_sub - num_classes))).T]
            flops += 2 * rc[0] * wo.shape[0] * k_sub

        out_shapes = []
        if need_cls:
            out_shapes.append(jax.ShapeDtypeStruct((n, k_lane), jnp.float32))
        if need_cams:
            out_shapes.append(jax.ShapeDtypeStruct((rc[-1], k_lane), jnp.float32))
        if need_seg:
            out_shapes.append(jax.ShapeDtypeStruct((k_sub, r_full), jnp.float32))

        bytes_accessed = int(
            sum(int(a.size) * np.dtype(a.dtype).itemsize for a in inputs)
            + sum(int(np.prod(s.shape)) * np.dtype(s.dtype).itemsize
                  for s in out_shapes))

        kernel = _build_fused_kernel(lay, n, need_cls, need_cams, need_seg)
        outs = pl.pallas_call(
            kernel,
            out_shape=tuple(out_shapes),
            in_specs=[_VMEM_SPEC] * len(inputs),
            out_specs=tuple([_VMEM_SPEC] * len(out_shapes)),
            cost_estimate=pl.CostEstimate(flops=int(flops), transcendentals=0,
                                          bytes_accessed=bytes_accessed),
        )(*inputs)
        outs = list(outs)

        side5 = hgt // 2 ** (n_stages - 1)
        cls_o = cams_o = seg_o = None
        if need_cls:
            cls_o = outs.pop(0)[:, :num_classes]
        if need_cams:
            cams_o = _rows_to_nchw(outs.pop(0)[:, :num_classes], n, side5)
        if need_seg:
            seg_o = _t_to_nchw(outs.pop(0)[:num_classes], n, hgt)
        return cls_o, cams_o, seg_o

    # ---- forward dispatch (same semantics as the PyTorch module) ------------
    def _forward_impl(self, x, model_mode, mode):
        assert model_mode is not None and mode is not None
        d = {'cls': None, 'cams': None, 'seg': None}
        need_cls = need_cams = need_seg = False
        if model_mode == ModelMode.classification:
            need_cls = mode == ProcessMode.train
            need_cams = mode == ProcessMode.infer
        elif model_mode == ModelMode.segmentation:
            need_cls = mode == ProcessMode.train
            need_cams = mode == ProcessMode.infer
            need_seg = mode in (ProcessMode.train, ProcessMode.infer)
        if need_cls or need_cams or need_seg:
            cls_o, cams_o, seg_o = self._fused(x, need_cls, need_cams, need_seg)
            if need_cls:
                d['cls'] = cls_o
            if need_cams:
                d['cams'] = cams_o
            if need_seg:
                d['seg'] = seg_o
        return d

    def forward(self, x, model_mode=ModelMode.classification,
                mode=ProcessMode.train):
        return self._forward(x, model_mode=model_mode, mode=mode)

    def __call__(self, *args, **kwargs):
        return self.forward(*args, **kwargs)

    def _forward_cam_impl(self, x):
        return self._fused(x, False, True, False)[1]

    def forward_cam(self, x):
        # TODO(synk): torch.set_grad_enabled(False) has no Pallas equivalent
        # (JAX forward passes do not track gradients); compute is identical.
        return self._forward_cam(x)

    def train(self, mode=True):
        # TODO(synk): the synthetic sub-models have no train/eval-dependent ops.
        return self

    def trainable_parameters(self):
        enc = [p for pair in self.encoder_model.params for p in pair]
        clf = [self.classifier_model.w, self.classifier_model.b]
        dec = [p for tup in (self.decoder_model.p4, self.decoder_model.p3,
                             self.decoder_model.p2, self.decoder_model.p1)
               for p in tup] + list(self.decoder_model.pout)
        return enc, clf, dec


# ----------------------------------------------------------------------------
# Plain-JAX reference of the same synthetic model (numerical check only)
# ----------------------------------------------------------------------------
def _reference_forward(x_nchw, encoder, classifier, decoder):
    def dense(h, w, b, relu):
        y = jnp.dot(h.astype(jnp.bfloat16), w,
                    preferred_element_type=jnp.float32) + b
        return jnp.maximum(y, 0.0) if relu else y

    def conv1x1(h, w, b, relu=True):
        n_, hh, ww, c_ = h.shape
        return dense(h.reshape(-1, c_), w, b, relu).reshape(n_, hh, ww, -1)

    x = jnp.transpose(x_nchw, (0, 2, 3, 1))
    feats, h = [], x
    for i, (w, b) in enumerate(encoder.params):
        if i > 0:
            n_, hh, ww, c_ = h.shape
            h = h.reshape(n_, hh // 2, 2, ww // 2, 2, c_).mean(axis=(2, 4))
        h = conv1x1(h, w, b)
        feats.append(h)
    x5 = feats[-1]

    cls = dense(x5.mean(axis=(1, 2)), classifier.w, classifier.b, relu=False)
    cams = jnp.transpose(
        conv1x1(x5, classifier.w, jnp.zeros_like(classifier.b), relu=True),
        (0, 3, 1, 2))

    d = x5
    for (wt, wb, b), skip in zip((decoder.p4, decoder.p3, decoder.p2, decoder.p1),
                                 (feats[3], feats[2], feats[1], feats[0])):
        up = jnp.repeat(jnp.repeat(d, 2, axis=1), 2, axis=2)
        n_, hh, ww, _ = up.shape
        y = (jnp.dot(up.reshape(-1, up.shape[-1]).astype(jnp.bfloat16), wt,
                     preferred_element_type=jnp.float32)
             + jnp.dot(skip.reshape(-1, skip.shape[-1]).astype(jnp.bfloat16), wb,
                       preferred_element_type=jnp.float32) + b)
        d = jnp.maximum(y, 0.0).reshape(n_, hh, ww, -1)
    wo, bo = decoder.pout
    seg = dense(d.reshape(-1, d.shape[-1]), wo, bo, relu=False)
    seg = seg.reshape(d.shape[0], d.shape[1], d.shape[2], -1)
    return cls, cams, jnp.transpose(seg, (0, 3, 1, 2))


def _assert_close(got, want, name, tol=5e-2):
    got = np.asarray(got, np.float32)
    want = np.asarray(want, np.float32)
    err = float(np.max(np.abs(got - want)) / (np.max(np.abs(want)) + 1e-6))
    assert err < tol, f"{name}: normalized max error {err:.4f} exceeds {tol}"


# ----------------------------------------------------------------------------
if __name__ == "__main__":
    key = jax.random.PRNGKey(0)
    k_in, k_enc, k_cls, k_dec = jax.random.split(key, 4)

    N, C_IN, H, W = 2, 3, 32, 32
    NUM_CLASSES = 4
    x = jax.random.normal(k_in, (N, C_IN, H, W), jnp.float32)   # NCHW input

    encoder = Encoder(k_enc, C_IN)
    classifier = Classifier(k_cls, Encoder.CHANNELS[-1], NUM_CLASSES)
    decoder = Decoder(k_dec, Encoder.CHANNELS, NUM_CLASSES)
    pipeline = Pipeline(encoder, classifier, decoder)

    out_cls = pipeline.forward(x, ModelMode.classification, ProcessMode.train)
    out_seg = pipeline.forward(x, ModelMode.segmentation, ProcessMode.infer)
    out_seg_tr = pipeline.forward(x, ModelMode.segmentation, ProcessMode.train)
    cams2 = pipeline.forward_cam(x)

    jax.block_until_ready(out_cls['cls'])
    jax.block_until_ready(out_seg['cams'])
    jax.block_until_ready(out_seg['seg'])
    jax.block_until_ready(out_seg_tr['cls'])
    jax.block_until_ready(out_seg_tr['seg'])
    jax.block_until_ready(cams2)

    side5 = H // 2 ** (len(Encoder.CHANNELS) - 1)
    assert out_cls['cls'].shape == (N, NUM_CLASSES)
    assert out_cls['cams'] is None and out_cls['seg'] is None
    assert out_seg['cams'].shape == (N, NUM_CLASSES, side5, side5)
    assert out_seg['seg'].shape == (N, NUM_CLASSES, H, W)
    assert out_seg['cls'] is None
    assert out_seg_tr['cls'].shape == (N, NUM_CLASSES)
    assert out_seg_tr['seg'].shape == (N, NUM_CLASSES, H, W)
    assert cams2.shape == (N, NUM_CLASSES, side5, side5)

    # numerical check of the fused Pallas kernel against a plain-JAX reference
    ref_cls, ref_cams, ref_seg = jax.jit(
        lambda xx: _reference_forward(xx, encoder, classifier, decoder))(x)
    _assert_close(out_cls['cls'], ref_cls, "cls")
    _assert_close(out_seg_tr['cls'], ref_cls, "cls(seg/train)")
    _assert_close(out_seg['cams'], ref_cams, "cams")
    _assert_close(cams2, ref_cams, "cams(forward_cam)")
    _assert_close(out_seg['seg'], ref_seg, "seg")
    _assert_close(out_seg_tr['seg'], ref_seg, "seg(train)")

    print("KERNEL_OK")
</pallas_src>

<mosaic_0001>
module attributes {stable_mosaic.version = 11 : i64} {
  func.func @kernel(%arg0: memref<8x2048xf32, #tpu.memory_space<vmem>>, %arg1: memref<8x8xbf16, #tpu.memory_space<vmem>>, %arg2: memref<8x1xf32, #tpu.memory_space<vmem>>, %arg3: memref<16x8xbf16, #tpu.memory_space<vmem>>, %arg4: memref<16x1xf32, #tpu.memory_space<vmem>>, %arg5: memref<32x16xbf16, #tpu.memory_space<vmem>>, %arg6: memref<32x1xf32, #tpu.memory_space<vmem>>, %arg7: memref<32x64xbf16, #tpu.memory_space<vmem>>, %arg8: memref<1x64xf32, #tpu.memory_space<vmem>>, %arg9: memref<64x64xbf16, #tpu.memory_space<vmem>>, %arg10: memref<1x64xf32, #tpu.memory_space<vmem>>, %arg11: memref<64x128xbf16, #tpu.memory_space<vmem>>, %arg12: memref<1x128xf32, #tpu.memory_space<vmem>>, %arg13: memref<2x128xf32, #tpu.memory_space<vmem>>) attributes {dimension_semantics = [], scalar_prefetch = 0 : i64, scratch_operands = 0 : i64, tpu.core_type = #tpu.core_type<tc>} {
    %c0 = arith.constant 0 : index
    %c0_0 = arith.constant 0 : index
    %0 = vector.load %arg0[%c0, %c0_0] : memref<8x2048xf32, #tpu.memory_space<vmem>>, vector<8x2048xf32>
    %c0_1 = arith.constant 0 : index
    %c0_2 = arith.constant 0 : index
    %1 = vector.load %arg1[%c0_1, %c0_2] : memref<8x8xbf16, #tpu.memory_space<vmem>>, vector<8x8xbf16>
    %2 = arith.truncf %0 : vector<8x2048xf32> to vector<8x2048xbf16>
    %cst = arith.constant dense<0.000000e+00> : vector<8x2048xf32>
    %3 = tpu.matmul %1, %2, %cst {dimension_numbers = #tpu.dot_dimension_numbers<[1], [0], [0], [1], [0, 0, 1, 1], [], []>} : vector<8x8xbf16>, vector<8x2048xbf16>, vector<8x2048xf32> -> vector<8x2048xf32>
    %c0_3 = arith.constant 0 : index
    %c0_4 = arith.constant 0 : index
    %4 = vector.load %arg2[%c0_3, %c0_4] : memref<8x1xf32, #tpu.memory_space<vmem>>, vector<8x1xf32>
    %5 = vector.broadcast %4 : vector<8x1xf32> to vector<8x2048xf32>
    %6 = arith.addf %3, %5 : vector<8x2048xf32>
    %cst_5 = arith.constant 0.000000e+00 : f32
    %7 = vector.broadcast %cst_5 : f32 to vector<8x2048xf32>
    %8 = arith.maximumf %6, %7 : vector<8x2048xf32>
    %9 = vector.extract_strided_slice %8 {offsets = [0, 0], sizes = [8, 512], strides = [1, 1]} : vector<8x2048xf32> to vector<8x512xf32>
    %10 = vector.extract_strided_slice %8 {offsets = [0, 512], sizes = [8, 512], strides = [1, 1]} : vector<8x2048xf32> to vector<8x512xf32>
    %11 = arith.addf %9, %10 : vector<8x512xf32>
    %12 = vector.extract_strided_slice %8 {offsets = [0, 1024], sizes = [8, 512], strides = [1, 1]} : vector<8x2048xf32> to vector<8x512xf32>
    %13 = arith.addf %11, %12 : vector<8x512xf32>
    %14 = vector.extract_strided_slice %8 {offsets = [0, 1536], sizes = [8, 512], strides = [1, 1]} : vector<8x2048xf32> to vector<8x512xf32>
    %15 = arith.addf %13, %14 : vector<8x512xf32>
    %cst_6 = arith.constant 2.500000e-01 : f32
    %16 = vector.broadcast %cst_6 : f32 to vector<8x512xf32>
    %17 = arith.mulf %16, %15 : vector<8x512xf32>
    %c0_7 = arith.constant 0 : index
    %c0_8 = arith.constant 0 : index
    %18 = vector.load %arg3[%c0_7, %c0_8] : memref<16x8xbf16, #tpu.memory_space<vmem>>, vector<16x8xbf16>
    %19 = arith.truncf %17 : vector<8x512xf32> to vector<8x512xbf16>
    %cst_9 = arith.constant dense<0.000000e+00> : vector<16x512xf32>
    %20 = tpu.matmul %18, %19, %cst_9 {dimension_numbers = #tpu.dot_dimension_numbers<[1], [0], [0], [1], [0, 0, 1, 1], [], []>} : vector<16x8xbf16>, vector<8x512xbf16>, vector<16x512xf32> -> vector<16x512xf32>
    %c0_10 = arith.constant 0 : index
    %c0_11 = arith.constant 0 : index
    %21 = vector.load %arg4[%c0_10, %c0_11] : memref<16x1xf32, #tpu.memory_space<vmem>>, vector<16x1xf32>
    %22 = vector.broadcast %21 : vector<16x1xf32> to vector<16x512xf32>
    %23 = arith.addf %20, %22 : vector<16x512xf32>
    %cst_12 = arith.constant 0.000000e+00 : f32
    %24 = vector.broadcast %cst_12 : f32 to vector<16x512xf32>
    %25 = arith.maximumf %23, %24 : vector<16x512xf32>
    %26 = vector.extract_strided_slice %25 {offsets = [0, 0], sizes = [16, 128], strides = [1, 1]} : vector<16x512xf32> to vector<16x128xf32>
    %27 = vector.extract_strided_slice %25 {offsets = [0, 128], sizes = [16, 128], strides = [1, 1]} : vector<16x512xf32> to vector<16x128xf32>
    %28 = arith.addf %26, %27 : vector<16x128xf32>
    %29 = vector.extract_strided_slice %25 {offsets = [0, 256], sizes = [16, 128], strides = [1, 1]} : vector<16x512xf32> to vector<16x128xf32>
    %30 = arith.addf %28, %29 : vector<16x128xf32>
    %31 = vector.extract_strided_slice %25 {offsets = [0, 384], sizes = [16, 128], strides = [1, 1]} : vector<16x512xf32> to vector<16x128xf32>
    %32 = arith.addf %30, %31 : vector<16x128xf32>
    %cst_13 = arith.constant 2.500000e-01 : f32
    %33 = vector.broadcast %cst_13 : f32 to vector<16x128xf32>
    %34 = arith.mulf %33, %32 : vector<16x128xf32>
    %c0_14 = arith.constant 0 : index
    %c0_15 = arith.constant 0 : index
    %35 = vector.load %arg5[%c0_14, %c0_15] : memref<32x16xbf16, #tpu.memory_space<vmem>>, vector<32x16xbf16>
    %36 = arith.truncf %34 : vector<16x128xf32> to vector<16x128xbf16>
    %cst_16 = arith.constant dense<0.000000e+00> : vector<32x128xf32>
    %37 = tpu.matmul %35, %36, %cst_16 {dimension_numbers = #tpu.dot_dimension_numbers<[1], [0], [0], [1], [0, 0, 1, 1], [], []>} : vector<32x16xbf16>, vector<16x128xbf16>, vector<32x128xf32> -> vector<32x128xf32>
    %c0_17 = arith.constant 0 : index
    %c0_18 = arith.constant 0 : index
    %38 = vector.load %arg6[%c0_17, %c0_18] : memref<32x1xf32, #tpu.memory_space<vmem>>, vector<32x1xf32>
    %39 = vector.broadcast %38 : vector<32x1xf32> to vector<32x128xf32>
    %40 = arith.addf %37, %39 : vector<32x128xf32>
    %cst_19 = arith.constant 0.000000e+00 : f32
    %41 = vector.broadcast %cst_19 : f32 to vector<32x128xf32>
    %42 = arith.maximumf %40, %41 : vector<32x128xf32>
    %43 = tpu.transpose %42, [1, 0] : vector<32x128xf32> -> vector<128x32xf32>
    %44 = vector.extract_strided_slice %43 {offsets = [0, 0], sizes = [32, 32], strides = [1, 1]} : vector<128x32xf32> to vector<32x32xf32>
    %45 = vector.extract_strided_slice %43 {offsets = [32, 0], sizes = [32, 32], strides = [1, 1]} : vector<128x32xf32> to vector<32x32xf32>
    %46 = arith.addf %44, %45 : vector<32x32xf32>
    %47 = vector.extract_strided_slice %43 {offsets = [64, 0], sizes = [32, 32], strides = [1, 1]} : vector<128x32xf32> to vector<32x32xf32>
    %48 = arith.addf %46, %47 : vector<32x32xf32>
    %49 = vector.extract_strided_slice %43 {offsets = [96, 0], sizes = [32, 32], strides = [1, 1]} : vector<128x32xf32> to vector<32x32xf32>
    %50 = arith.addf %48, %49 : vector<32x32xf32>
    %cst_20 = arith.constant 2.500000e-01 : f32
    %51 = vector.broadcast %cst_20 : f32 to vector<32x32xf32>
    %52 = arith.mulf %51, %50 : vector<32x32xf32>
    %c0_21 = arith.constant 0 : index
    %c0_22 = arith.constant 0 : index
    %53 = vector.load %arg7[%c0_21, %c0_22] : memref<32x64xbf16, #tpu.memory_space<vmem>>, vector<32x64xbf16>
    %54 = arith.truncf %52 : vector<32x32xf32> to vector<32x32xbf16>
    %cst_23 = arith.constant dense<0.000000e+00> : vector<32x64xf32>
    %55 = tpu.matmul %54, %53, %cst_23 {dimension_numbers = #tpu.dot_dimension_numbers<[1], [0], [0], [1], [0, 0, 1, 1], [], []>} : vector<32x32xbf16>, vector<32x64xbf16>, vector<32x64xf32> -> vector<32x64xf32>
    %c0_24 = arith.constant 0 : index
    %c0_25 = arith.constant 0 : index
    %56 = vector.load %arg8[%c0_24, %c0_25] : memref<1x64xf32, #tpu.memory_space<vmem>>, vector<1x64xf32>
    %57 = vector.broadcast %56 : vector<1x64xf32> to vector<32x64xf32>
    %58 = arith.addf %55, %57 : vector<32x64xf32>
    %cst_26 = arith.constant 0.000000e+00 : f32
    %59 = vector.broadcast %cst_26 : f32 to vector<32x64xf32>
    %60 = arith.maximumf %58, %59 : vector<32x64xf32>
    %61 = vector.extract_strided_slice %60 {offsets = [0, 0], sizes = [8, 64], strides = [1, 1]} : vector<32x64xf32> to vector<8x64xf32>
    %62 = vector.extract_strided_slice %60 {offsets = [8, 0], sizes = [8, 64], strides = [1, 1]} : vector<32x64xf32> to vector<8x64xf32>
    %63 = arith.addf %61, %62 : vector<8x64xf32>
    %64 = vector.extract_strided_slice %60 {offsets = [16, 0], sizes = [8, 64], strides = [1, 1]} : vector<32x64xf32> to vector<8x64xf32>
    %65 = arith.addf %63, %64 : vector<8x64xf32>
    %66 = vector.extract_strided_slice %60 {offsets = [24, 0], sizes = [8, 64], strides = [1, 1]} : vector<32x64xf32> to vector<8x64xf32>
    %67 = arith.addf %65, %66 : vector<8x64xf32>
    %cst_27 = arith.constant 2.500000e-01 : f32
    %68 = vector.broadcast %cst_27 : f32 to vector<8x64xf32>
    %69 = arith.mulf %68, %67 : vector<8x64xf32>
    %c0_28 = arith.constant 0 : index
    %c0_29 = arith.constant 0 : index
    %70 = vector.load %arg9[%c0_28, %c0_29] : memref<64x64xbf16, #tpu.memory_space<vmem>>, vector<64x64xbf16>
    %71 = arith.truncf %69 : vector<8x64xf32> to vector<8x64xbf16>
    %cst_30 = arith.constant dense<0.000000e+00> : vector<8x64xf32>
    %72 = tpu.matmul %71, %70, %cst_30 {dimension_numbers = #tpu.dot_dimension_numbers<[1], [0], [0], [1], [0, 0, 1, 1], [], []>} : vector<8x64xbf16>, vector<64x64xbf16>, vector<8x64xf32> -> vector<8x64xf32>
    %c0_31 = arith.constant 0 : index
    %c0_32 = arith.constant 0 : index
    %73 = vector.load %arg10[%c0_31, %c0_32] : memref<1x64xf32, #tpu.memory_space<vmem>>, vector<1x64xf32>
    %74 = vector.broadcast %73 : vector<1x64xf32> to vector<8x64xf32>
    %75 = arith.addf %72, %74 : vector<8x64xf32>
    %cst_33 = arith.constant 0.000000e+00 : f32
    %76 = vector.broadcast %cst_33 : f32 to vector<8x64xf32>
    %77 = arith.maximumf %75, %76 : vector<8x64xf32>
    %78 = vector.extract_strided_slice %77 {offsets = [0, 0], sizes = [2, 64], strides = [1, 1]} : vector<8x64xf32> to vector<2x64xf32>
    %79 = vector.extract_strided_slice %77 {offsets = [2, 0], sizes = [2, 64], strides = [1, 1]} : vector<8x64xf32> to vector<2x64xf32>
    %80 = arith.addf %78, %79 : vector<2x64xf32>
    %81 = vector.extract_strided_slice %77 {offsets = [4, 0], sizes = [2, 64], strides = [1, 1]} : vector<8x64xf32> to vector<2x64xf32>
    %82 = arith.addf %80, %81 : vector<2x64xf32>
    %83 = vector.extract_strided_slice %77 {offsets = [6, 0], sizes = [2, 64], strides = [1, 1]} : vector<8x64xf32> to vector<2x64xf32>
    %84 = arith.addf %82, %83 : vector<2x64xf32>
    %cst_34 = arith.constant 2.500000e-01 : f32
    %85 = vector.broadcast %cst_34 : f32 to vector<2x64xf32>
    %86 = arith.mulf %84, %85 : vector<2x64xf32>
    %c0_35 = arith.constant 0 : index
    %c0_36 = arith.constant 0 : index
    %87 = vector.load %arg11[%c0_35, %c0_36] : memref<64x128xbf16, #tpu.memory_space<vmem>>, vector<64x128xbf16>
    %88 = arith.truncf %86 : vector<2x64xf32> to vector<2x64xbf16>
    %cst_37 = arith.constant dense<0.000000e+00> : vector<2x128xf32>
    %89 = tpu.matmul %88, %87, %cst_37 {dimension_numbers = #tpu.dot_dimension_numbers<[1], [0], [0], [1], [0, 0, 1, 1], [], []>} : vector<2x64xbf16>, vector<64x128xbf16>, vector<2x128xf32> -> vector<2x128xf32>
    %c0_38 = arith.constant 0 : index
    %c0_39 = arith.constant 0 : index
    %90 = vector.load %arg12[%c0_38, %c0_39] : memref<1x128xf32, #tpu.memory_space<vmem>>, vector<1x128xf32>
    %91 = vector.broadcast %90 : vector<1x128xf32> to vector<2x128xf32>
    %92 = arith.addf %89, %91 : vector<2x128xf32>
    %c0_40 = arith.constant 0 : index
    %c0_41 = arith.constant 0 : index
    %93 = vector.load %arg13[%c0_40, %c0_41] : memref<2x128xf32, #tpu.memory_space<vmem>>, vector<2x128xf32>
    tpu.vector_store %arg13[%c0_40, %c0_41], %92 {strides = array<i32>} : memref<2x128xf32, #tpu.memory_space<vmem>>, vector<2x128xf32>,
    return
  }
}

</mosaic_0001>

<bundles_post_ra>
// kernel: _forward_impl.1
= control target key start
LH: loop header
LB: loop body
LE: loop exit
PB: predicated region body
PF: predicated region fallthrough
CT: control target
= control target key end

     0   :  { %vm89_vm0 = vcmask 1043456   ;;  %v1208_v7 = vmov 0   ;;  %vm85_vm1 = vcmask 64512   ;;  %s1460_s0 = inlined_call_operand.vmem [shape: f32[8,2048], index: 0, kind: input, shape index: {}]   ;;  %s1461_s1 = inlined_call_operand.vmem [shape: bf16[8,8], index: 1, kind: input, shape index: {}]   ;;  %s1462_s2 = inlined_call_operand.vmem [shape: f32[8,1], index: 2, kind: input, shape index: {}]   ;;  %s1463_s3 = inlined_call_operand.vmem [shape: bf16[16,8], index: 3, kind: input, shape index: {}]   ;;  %s1464_s4 = inlined_call_operand.vmem [shape: f32[16,1], index: 4, kind: input, shape index: {}]   ;;  %s1465_s5 = inlined_call_operand.vmem [shape: bf16[32,16], index: 5, kind: input, shape index: {}]   ;;  %s1466_s6 = inlined_call_operand.vmem [shape: f32[32,1], index: 6, kind: input, shape index: {}]   ;;  %s1467_s7 = inlined_call_operand.vmem [shape: bf16[32,64], index: 7, kind: input, shape index: {}]   ;;  %s1468_s8 = inlined_call_operand.vmem [shape: f32[1,64], index: 8, kind: input, shape index: {}]   ;;  %s1469_s9 = inlined_call_operand.vmem [shape: bf16[64,64], index: 9, kind: input, shape index: {}]   ;;  %s1470_s10 = inlined_call_operand.vmem [shape: f32[1,64], index: 10, kind: input, shape index: {}]   ;;  %s1471_s11 = inlined_call_operand.vmem [shape: bf16[64,128], index: 11, kind: input, shape index: {}]   ;;  %s1472_s12 = inlined_call_operand.vmem [shape: f32[1,128], index: 12, kind: input, shape index: {}]   ;;  %s1473_s13 = inlined_call_operand.hbm [shape: f32[2,128], index: 13, kind: output, shape index: {}]  }
   0x1   :  { %v47_v0 = vld [vmem:[%s1460_s0 + $0x8] sm:$0xff]  ;;  %v49_v1 = vld [vmem:[%s1460_s0 + $0x18] sm:$0xff]  ;;  %v46_v2 = vld [vmem:[%s1460_s0] sm:$0xff]  ;;  %170 = vmatprep.mubr.bf16.mxu0 %v1208_v7  ;;  %211 = vmatprep.mubr.bf16.mxu1 %v1208_v7 }
   0x2   :  { %v64_v3 = vpack.c.bf16 %v47_v0, %v47_v0  ;;  %v66_v4 = vpack.c.bf16 %v49_v1, %v49_v1  ;;  %v63_v5 = vpack.c.bf16 %v46_v2, %v46_v2  ;;  %v48_v6 = vld [vmem:[%s1460_s0 + $0x10] sm:$0xff]  ;;  %v51_v8 = vld [vmem:[%s1460_s0 + $0x28] sm:$0xff]  ;;  %v53_v11 = vld [vmem:[%s1460_s0 + $0x38] sm:$0xff]  ;;  %1169 = vset.pattern.permute.xlu0 %v1208_v7  ;;  %1170 = vset.pattern.permute.xlu1 %v1208_v7 }
   0x3   :  { %v65_v9 = vpack.c.bf16 %v48_v6, %v48_v6  ;;  %v68_v10 = vpack.c.bf16 %v51_v8, %v51_v8  ;;  %v50_v12 = vld [vmem:[%s1460_s0 + $0x20] sm:$0xff]  ;;  %v52_v13 = vld [vmem:[%s1460_s0 + $0x30] sm:$0xff]  ;;  %v70_v15 = vpack.c.bf16 %v53_v11, %v53_v11  ;;  %v55_v18 = vld [vmem:[%s1460_s0 + $0x48] sm:$0xff] }
   0x4   :  { %1068 = vmatprep.subr.msk.bf16.mxu0 %vm89_vm0, %v64_v3  ;;  %1070 = vmatprep.subr.msk.bf16.mxu1 %vm89_vm0, %v66_v4  ;;  %v91_v14 = vsel %vm89_vm0, %v63_v5, 0  ;;  %v67_v16 = vpack.c.bf16 %v50_v12, %v50_v12  ;;  %v69_v17 = vpack.c.bf16 %v52_v13, %v52_v13  ;;  %v54_v19 = vld [vmem:[%s1460_s0 + $0x40] sm:$0xff]  ;;  %v57_v22 = vld [vmem:[%s1460_s0 + $0x58] sm:$0xff]  ;;  %v56_v24 = vld [vmem:[%s1460_s0 + $0x50] sm:$0xff]  ;;  %v72_v29 = vpack.c.bf16 %v55_v18, %v55_v18 }
   0x5   :  { %139 = vmatpush1.bf16.msra.mxu0 %v91_v14  ;;  %v97_v20 = vsel %vm89_vm0, %v65_v9, 0  ;;  %v62_v21 = vld [vmem:[%s1461_s1] sm:$0xf]  ;;  %v71_v23 = vpack.c.bf16 %v54_v19, %v54_v19  ;;  %v73_v26 = vpack.c.bf16 %v56_v24, %v56_v24  ;;  %v74_v30 = vpack.c.bf16 %v57_v22, %v57_v22  ;;  %v59_v34 = vld [vmem:[%s1460_s0 + $0x68] sm:$0xff]  ;;  %v61_v35 = vld [vmem:[%s1460_s0 + $0x78] sm:$0xff] }
   0x6   :  { %180 = vmatpush1.bf16.msra.mxu1 %v97_v20  ;;  %1072 = vmatprep.subr.msk.bf16.mxu0 %vm89_vm0, %v68_v10  ;;  %v103_v25 = vsel %vm89_vm0, %v67_v16, 0  ;;  %v79_v27 = vld [vmem:[%s1462_s2] sm:$0xff]  ;;  %v109_v28 = vsel %vm89_vm0, %v69_v17, 0  ;;  %v644_v36 = vld [vmem:[%s1466_s6 + $0x8] sm:$0xff]  ;;  %v60_v38 = vld [vmem:[%s1460_s0 + $0x70] sm:$0xff]  ;;  %v76_v39 = vpack.c.bf16 %v59_v34, %v59_v34  ;;  %v78_v40 = vpack.c.bf16 %v61_v35, %v61_v35 }
   0x7   :  { %1074 = vmatprep.subr.msk.bf16.mxu1 %vm89_vm0, %v70_v15  ;;  %82 = vperm.xlu0 %1169, %v79_v27   ;;  %v115_v31 = vsel %vm89_vm0, %v71_v23, 0  ;;  %v121_v32 = vsel %vm89_vm0, %v73_v26, 0  ;;  %v504_v33 = vld [vmem:[%s1464_s4] sm:$0xff]  ;;  %v646_v41 = vld [vmem:[%s1466_s6 + $0x18] sm:$0xff] }
   0x8   :  { %1069 = vmatmul.mubr.msk.bf16.vlgmr.msra.gmra.mrb[0].mxu0 %vm85_vm1, %v62_v21  ;;  %v58_v37 = vld [vmem:[%s1460_s0 + $0x60] sm:$0xff] }
   0x9   :  { %1071 = vmatmul.mubr.msk.bf16.vlgmr.msra.gmra.mrb[0].mxu1 %vm85_vm1, %v62_v21  ;;  %221 = vmatpush1.bf16.msra.mxu0 %v103_v25 }
   0xa   :  { %262 = vmatpush1.bf16.msra.mxu1 %v109_v28  ;;  %252 = vmatprep.mubr.bf16.mxu0 %v1208_v7 }
   0xb   :  { %293 = vmatprep.mubr.bf16.mxu1 %v1208_v7  ;;  %1076 = vmatprep.subr.msk.bf16.mxu0 %vm89_vm0, %v72_v29 }
   0xc   :  { %1078 = vmatprep.subr.msk.bf16.mxu1 %vm89_vm0, %v74_v30  ;;  %508 = vperm.xlu0 %1169, %v504_v33  }
  0x10   :  { %1073 = vmatmul.mubr.msk.bf16.vlgmr.msra.gmra.mrb[4].mxu0 %vm85_vm1, %v62_v21  ;;  %654 = vperm.xlu0 %1169, %v644_v36  }
  0x11   :  { %1075 = vmatmul.mubr.msk.bf16.vlgmr.msra.gmra.mrb[4].mxu1 %vm85_vm1, %v62_v21  ;;  %303 = vmatpush1.bf16.msra.mxu0 %v115_v31 }
  0x12   :  { %18 = vsyncpa [#allocation3], 0  ;;  %344 = vmatpush1.bf16.msra.mxu1 %v121_v32  ;;  %334 = vmatprep.mubr.bf16.mxu0 %v1208_v7  ;;  %v75_v42 = vpack.c.bf16 %v58_v37, %v58_v37  ;;  %v77_v43 = vpack.c.bf16 %v60_v38, %v60_v38  ;;  %v505_v46 = vld [vmem:[%s1464_s4 + $0x8] sm:$0xff]  ;;  %v643_v47 = vld [vmem:[%s1466_s6] sm:$0xff]  ;;  %vm677_vm2 = vcmask 130048   ;;  %vm810_vm3 = vcmask 261120  }
  0x13   :  { %375 = vmatprep.mubr.bf16.mxu1 %v1208_v7  ;;  %1080 = vmatprep.subr.msk.bf16.mxu0 %vm89_vm0, %v76_v39  ;;  %v645_v48 = vld [vmem:[%s1466_s6 + $0x10] sm:$0xff]  ;;  %vm1210_vm4 = vmmov 0   ;;  %vm914_vm5 = vcmask 523264  }
  0x14   :  { %1082 = vmatprep.subr.msk.bf16.mxu1 %vm89_vm0, %v78_v40  ;;  %664 = vperm.xlu0 %1169, %v646_v41   ;;  %v127_v44 = vsel %vm89_vm0, %v75_v42, 0  ;;  %v133_v45 = vsel %vm89_vm0, %v77_v43, 0 }
  0x15   :  { %513 = vperm.xlu1 %1170, %v505_v46  }
  0x18   :  { %1077 = vmatmul.mubr.msk.bf16.vlgmr.msra.gmra.mrb[8].mxu0 %vm85_vm1, %v62_v21 }
  0x19   :  { %1079 = vmatmul.mubr.msk.bf16.vlgmr.msra.gmra.mrb[8].mxu1 %vm85_vm1, %v62_v21  ;;  %385 = vmatpush1.bf16.msra.mxu0 %v127_v44 }
  0x1a   :  { %426 = vmatpush1.bf16.msra.mxu1 %v133_v45  ;;  %416 = vmatprep.mubr.bf16.mxu0 %v1208_v7 }
  0x1b   :  { %457 = vmatprep.mubr.bf16.mxu1 %v1208_v7  ;;  %649 = vperm.xlu1 %1170, %v643_v47  }
  0x1f   :  { %659 = vperm.xlu1 %1170, %v645_v48  }
  0x20   :  { %1081 = vmatmul.mubr.msk.bf16.vlgmr.msra.gmra.mrb[12].mxu0 %vm85_vm1, %v62_v21 }
  0x21   :  { %1083 = vmatmul.mubr.msk.bf16.vlgmr.msra.gmra.mrb[12].mxu1 %vm85_vm1, %v62_v21  ;;  %568 = vmatprep.mubr.bf16.mxu0 %v1208_v7 }
  0x22   :  { %611 = vmatprep.mubr.bf16.mxu1 %v1208_v7 }
  0x86   :  { %v83_v56 = vpop.permute.xlu0 %82 }
  0xdb   :  { %v172_v49 = vpop.f32.mrb[0].mxu0 }
  0xdc   :  { %v213_v50 = vpop.f32.mrb[0].mxu1  ;;  %v174_v51 = vpop.f32.mrb[1].mxu0  ;;  %v173_v58 = vadd.f32 %v172_v49, %v83_v56 }
  0xdd   :  { %v215_v52 = vpop.f32.mrb[1].mxu1  ;;  %v176_v53 = vpop.f32.mrb[2].mxu0  ;;  %v214_v59 = vadd.f32 %v213_v50, %v83_v56  ;;  %v175_v60 = vadd.f32 %v174_v51, %v83_v56 }
  0xde   :  { %v217_v54 = vpop.f32.mrb[2].mxu1  ;;  %v177_v55 = vpop.f32.mrb[3].mxu0  ;;  %v216_v62 = vadd.f32 %v215_v52, %v83_v56  ;;  %v466_v6 = vmax.f32 %v173_v58, 0.0 }
  0xdf   :  { %v218_v57 = vpop.f32.mrb[3].mxu1  ;;  %v468_v11 = vmax.f32 %v214_v59, 0.0  ;;  %v467_v12 = vmax.f32 %v175_v60, 0.0 }
  0xe0   :  { %v469_v16 = vmax.f32 %v216_v62, 0.0 }
  0xe3   :  { %v254_v61 = vpop.f32.mrb[4].mxu0 }
  0xe4   :  { %v255_v63 = vadd.f32 %v254_v61, %v83_v56  ;;  %v295_v0 = vpop.f32.mrb[4].mxu1  ;;  %v256_v1 = vpop.f32.mrb[5].mxu0 }
  0xe5   :  { %v296_v2 = vadd.f32 %v295_v0, %v83_v56  ;;  %v257_v3 = vadd.f32 %v256_v1, %v83_v56  ;;  %v297_v4 = vpop.f32.mrb[5].mxu1  ;;  %v258_v5 = vpop.f32.mrb[6].mxu0 }
  0xe6   :  { %v470_v7 = vmax.f32 %v255_v63, 0.0  ;;  %v298_v8 = vadd.f32 %v297_v4, %v83_v56  ;;  %v299_v9 = vpop.f32.mrb[6].mxu1  ;;  %v259_v10 = vpop.f32.mrb[7].mxu0 }
  0xe7   :  { %v472_v13 = vmax.f32 %v296_v2, 0.0  ;;  %v471_v14 = vmax.f32 %v257_v3, 0.0  ;;  %v300_v15 = vpop.f32.mrb[7].mxu1  ;;  %v1172_v9 = vld [vmem:[%s1465_s5] sm:$0xff]   ;;  %v509_v10 = vpop.permute.xlu0 %508 }
  0xe8   :  { %v482_v17 = vadd.f32 %v470_v7, %v466_v6  ;;  %v473_v18 = vmax.f32 %v298_v8, 0.0  ;;  %v1171_v8 = vld [vmem:[%s1463_s3] sm:$0xff]  }
  0xe9   :  { %v484_v19 = vadd.f32 %v472_v13, %v468_v11  ;;  %v483_v20 = vadd.f32 %v471_v14, %v467_v12  ;;  %v514_v11 = vpop.permute.xlu1 %513 }
  0xea   :  { %v485_v21 = vadd.f32 %v473_v18, %v469_v16 }
  0xeb   :  { %v336_v22 = vpop.f32.mrb[8].mxu0 }
  0xec   :  { %v337_v23 = vadd.f32 %v336_v22, %v83_v56  ;;  %v377_v24 = vpop.f32.mrb[8].mxu1  ;;  %v338_v25 = vpop.f32.mrb[9].mxu0 }
  0xed   :  { %v378_v26 = vadd.f32 %v377_v24, %v83_v56  ;;  %v339_v27 = vadd.f32 %v338_v25, %v83_v56  ;;  %v379_v28 = vpop.f32.mrb[9].mxu1  ;;  %v340_v29 = vpop.f32.mrb[10].mxu0 }
  0xee   :  { %v474_v30 = vmax.f32 %v337_v23, 0.0  ;;  %v380_v31 = vadd.f32 %v379_v28, %v83_v56  ;;  %v381_v32 = vpop.f32.mrb[10].mxu1  ;;  %v341_v33 = vpop.f32.mrb[11].mxu0 }
  0xef   :  { %v476_v34 = vmax.f32 %v378_v26, 0.0  ;;  %v475_v35 = vmax.f32 %v339_v27, 0.0  ;;  %v382_v36 = vpop.f32.mrb[11].mxu1 }
  0xf0   :  { %v486_v37 = vadd.f32 %v482_v17, %v474_v30  ;;  %v477_v38 = vmax.f32 %v380_v31, 0.0 }
  0xf1   :  { %v488_v39 = vadd.f32 %v484_v19, %v476_v34  ;;  %v487_v40 = vadd.f32 %v483_v20, %v475_v35 }
  0xf2   :  { %v489_v41 = vadd.f32 %v485_v21, %v477_v38 }
  0xf3   :  { %v418_v42 = vpop.f32.mrb[12].mxu0 }
  0xf4   :  { %v419_v43 = vadd.f32 %v418_v42, %v83_v56  ;;  %v459_v44 = vpop.f32.mrb[12].mxu1  ;;  %v420_v45 = vpop.f32.mrb[13].mxu0 }
  0xf5   :  { %v460_v46 = vadd.f32 %v459_v44, %v83_v56  ;;  %v421_v47 = vadd.f32 %v420_v45, %v83_v56  ;;  %v461_v48 = vpop.f32.mrb[13].mxu1  ;;  %v422_v49 = vpop.f32.mrb[14].mxu0  ;;  %v1173_v45 = vld [vmem:[%s1465_s5 + $0x8] sm:$0xff]  }
  0xf6   :  { %v478_v50 = vmax.f32 %v419_v43, 0.0  ;;  %v462_v51 = vadd.f32 %v461_v48, %v83_v56  ;;  %v463_v52 = vpop.f32.mrb[14].mxu1  ;;  %v423_v53 = vpop.f32.mrb[15].mxu0 }
  0xf7   :  { %v480_v54 = vmax.f32 %v460_v46, 0.0  ;;  %v479_v55 = vmax.f32 %v421_v47, 0.0  ;;  %v464_v57 = vpop.f32.mrb[15].mxu1  ;;  %v650_v47 = vpop.permute.xlu1 %649 }
  0xf8   :  { %v490_v58 = vadd.f32 %v486_v37, %v478_v50  ;;  %v481_v59 = vmax.f32 %v462_v51, 0.0  ;;  %v655_v51 = vpop.permute.xlu0 %654 }
  0xf9   :  { %v492_v60 = vadd.f32 %v488_v39, %v480_v54  ;;  %v491_v61 = vadd.f32 %v487_v40, %v479_v55 }
  0xfa   :  { %v494_v62 = vmul.f32 0.25, %v490_v58  ;;  %v493_v63 = vadd.f32 %v489_v41, %v481_v59 }
  0xfb   :  { %v496_v0 = vmul.f32 0.25, %v492_v60  ;;  %v495_v1 = vmul.f32 0.25, %v491_v61  ;;  %v660_v55 = vpop.permute.xlu1 %659 }
  0xfc   :  { %v500_v2 = vpack.c.bf16 %v494_v62, %v494_v62  ;;  %v497_v3 = vmul.f32 0.25, %v493_v63  ;;  %v665_v59 = vpop.permute.xlu0 %664  ;;  %v1174_v63 = vld [vmem:[%s1467_s7] sm:$0xff]  }
  0xfd   :  { %v502_v4 = vpack.c.bf16 %v496_v0, %v496_v0  ;;  %v501_v5 = vpack.c.bf16 %v495_v1, %v495_v1  ;;  %v1175_v0 = vld [vmem:[%s1467_s7 + $0x8] sm:$0xff]  }
  0xfe   :  { %v503_v6 = vpack.c.bf16 %v497_v3, %v497_v3  ;;  %v525_v56 = vsel %vm89_vm0, %v500_v2, 0 }
  0xff   :  { %1085 = vmatprep.subr.msk.bf16.mxu0 %vm89_vm0, %v501_v5  ;;  %v531_v7 = vsel %vm89_vm0, %v502_v4, 0 }
 0x100   :  { %1087 = vmatprep.subr.msk.bf16.mxu1 %vm89_vm0, %v503_v6  ;;  %537 = vmatpush1.bf16.msra.mxu0 %v525_v56 }
 0x101   :  { %580 = vmatpush1.bf16.msra.mxu1 %v531_v7 }
 0x102   :  { %1133 = vmatprep.subr.bf16.mxu1 %v1174_v63 }
 0x103   :  { %1086 = vmatmul.mubr.msk.bf16.vlgmr.msra.gmra.mrb[16].mxu0 %vm85_vm1, %v1171_v8 }
 0x104   :  { %1088 = vmatmul.mubr.msk.bf16.vlgmr.msra.gmra.mrb[16].mxu1 %vm85_vm1, %v1171_v8  ;;  %1129 = vmatprep.mubr.msk.bf16.mxu0 %vm677_vm2, %v1172_v9 }
 0x105   :  { %1134 = vmatpush3.bf16.msra.mxu1 %v1174_v63 }
 0x106   :  { %1135 = vmatprep.subr.bf16.mxu1 %v1175_v0 }
 0x109   :  { %1136 = vmatpush3.bf16.msra.mxu1 %v1175_v0 }
 0x1d6   :  { %v570_v12 = vpop.f32.mrb[16].mxu0 }
 0x1d7   :  { %v571_v13 = vadd.f32 %v570_v12, %v509_v10  ;;  %v613_v14 = vpop.f32.mrb[16].mxu1  ;;  %v572_v15 = vpop.f32.mrb[17].mxu0 }
 0x1d8   :  { %v614_v16 = vadd.f32 %v613_v14, %v509_v10  ;;  %v573_v17 = vadd.f32 %v572_v15, %v509_v10  ;;  %v615_v18 = vpop.f32.mrb[17].mxu1  ;;  %v574_v19 = vpop.f32.mrb[18].mxu0 }
 0x1d9   :  { %v622_v20 = vmax.f32 %v571_v13, 0.0  ;;  %v575_v21 = vadd.f32 %v574_v19, %v514_v11  ;;  %v617_v22 = vpop.f32.mrb[18].mxu1  ;;  %v576_v23 = vpop.f32.mrb[19].mxu0  ;;  %v616_v25 = vadd.f32 %v615_v18, %v509_v10 }
 0x1da   :  { %v623_v24 = vmax.f32 %v573_v17, 0.0  ;;  %v618_v26 = vadd.f32 %v617_v22, %v514_v11  ;;  %v577_v27 = vadd.f32 %v576_v23, %v514_v11  ;;  %v619_v28 = vpop.f32.mrb[19].mxu1  ;;  %v624_v30 = vmax.f32 %v614_v16, 0.0 }
 0x1db   :  { %v626_v29 = vmax.f32 %v575_v21, 0.0  ;;  %v620_v33 = vadd.f32 %v619_v28, %v514_v11  ;;  %v625_v34 = vmax.f32 %v616_v25, 0.0 }
 0x1dc   :  { %v630_v31 = vadd.f32 %v623_v24, %v622_v20  ;;  %v627_v32 = vmax.f32 %v577_v27, 0.0  ;;  %v628_v36 = vmax.f32 %v618_v26, 0.0 }
 0x1dd   :  { %v629_v39 = vmax.f32 %v620_v33, 0.0 }
 0x1de   :  { %v632_v35 = vadd.f32 %v630_v31, %v624_v30  ;;  %v631_v37 = vadd.f32 %v627_v32, %v626_v29 }
 0x1e0   :  { %v634_v38 = vadd.f32 %v632_v35, %v625_v34  ;;  %v633_v40 = vadd.f32 %v631_v37, %v628_v36  ;;  %v1176_v34 = vld [vmem:[%s1469_s9] sm:$0xff]   ;;  %v1209_v35 = vmov 0.0   ;;  %v1177_v36 = vld [vmem:[%s1469_s9 + $0x8] sm:$0xff]   ;;  %v1178_v37 = vld [vmem:[%s1469_s9 + $0x10] sm:$0xff]  }
 0x1e1   :  { %1153 = vmatprep.subr.bf16.mxu1 %v1209_v35 }
 0x1e2   :  { %v635_v41 = vadd.f32 %v633_v40, %v629_v39  ;;  %v636_v42 = vmul.f32 0.25, %v634_v38  ;;  %v1179_v38 = vld [vmem:[%s1469_s9 + $0x18] sm:$0xff]   ;;  %v1093_v39 = vld [vmem:[%s1468_s8] ss:$0 sm:$0xff] }
 0x1e4   :  { %v637_v43 = vmul.f32 0.25, %v635_v41 }
 0x1e6   :  { %v642_v44 = vpack.c.bf16 %v637_v43, %v636_v42 }
 0x1e8   :  { %1127 = vmatprep.subr.bf16.mxu0 %v642_v44 }
 0x1e9   :  { %1128 = vmatpush3.bf16.msra.mxu0 %v642_v44 }
 0x1ea   :  { %1141 = vmatprep.subr.bf16.mxu0 %v1209_v35 }
 0x1ec   :  { %1130 = vmatmul.mubr.msk.bf16.vlgmr.msra.gmra.mrb[20].mxu0 %vm677_vm2, %v1173_v45 }
 0x1ed   :  { %1142 = vmatpush3.bf16.msra.mxu0 %v1176_v34  ;;  %1149 = vmatprep.mubr.msk.bf16.mxu0 %vm1210_vm4, %v1209_v35 }
 0x1ee   :  { %1143 = vmatprep.subr.bf16.mxu0 %v1209_v35 }
 0x1f1   :  { %1144 = vmatpush3.bf16.msra.mxu0 %v1177_v36 }
 0x1f2   :  { %1145 = vmatprep.subr.bf16.mxu0 %v1209_v35 }
 0x1f5   :  { %1146 = vmatpush3.bf16.msra.mxu0 %v1178_v37 }
 0x1f6   :  { %1147 = vmatprep.subr.bf16.mxu0 %v1209_v35 }
 0x1f9   :  { %1148 = vmatpush3.bf16.msra.mxu0 %v1179_v38 }
 0x2bf   :  { %v1131_v46 = vpop.f32.mrb[20].mxu0 }
 0x2c0   :  { %v718_v48 = vpop.f32.mrb[21].mxu0  ;;  %v727_v57 = vadd.f32 %v1131_v46, %v660_v55 }
 0x2c1   :  { %v719_v49 = vadd.f32 %v718_v48, %v650_v47  ;;  %v1132_v50 = vpop.f32.mrb[22].mxu0 }
 0x2c2   :  { %v721_v52 = vpop.f32.mrb[23].mxu0  ;;  %v735_v60 = vmax.f32 %v727_v57, 0.0  ;;  %v730_v61 = vadd.f32 %v1132_v50, %v665_v59  ;;  %v1181_v59 = vld [vmem:[%s1471_s11 + $0x8] sm:$0xff]  }
 0x2c3   :  { %v733_v53 = vmax.f32 %v719_v49, 0.0  ;;  %v722_v54 = vadd.f32 %v721_v52, %v655_v51 }
 0x2c4   :  { %v736_v62 = vmax.f32 %v730_v61, 0.0  ;;  %v1183_v61 = vld [vmem:[%s1471_s11 + $0x18] sm:$0xff]  }
 0x2c5   :  { %737 = vxpose.xlu1.b32.start [1/4] (short) %v733_v53, 128  ;;  %v734_v58 = vmax.f32 %v722_v54, 0.0 }
 0x2c9   :  { %738 = vxpose.xlu1.b32.cont [2/4] (short) %v734_v58, 128  ;;  %v1180_v58 = vld [vmem:[%s1471_s11] sm:$0xff]  }
 0x2cd   :  { %739 = vxpose.xlu1.b32.cont [3/4] (short) %v735_v60, 128  ;;  %v1182_v60 = vld [vmem:[%s1471_s11 + $0x10] sm:$0xff]  }
 0x2d1   :  { %740 = vxpose.xlu1.b32.end [4/4] (short) %v736_v62, 128  ;;  %v1098_v62 = vld [vmem:[%s1470_s10] ss:$0 sm:$0xff]  ;;  %s1211_s10 = smov [#allocation2]  }
 0x2d2   :  { %s1060_s3 = sshll.u32 %s1211_s10, 4  ;;  %s1061_s3 = int_to_ptr.vmem [resolvable:$true] %s1060_s3 }
 0x2d3   :  { %s1184_s2 = scalar_lea.vmem %s1061_s3, 32  ;;  %p1189_p1 = scmp.lt.s32.totalorder %s1061_s3, %s1061_s3 }
 0x2d4   :  { %p1185_p0 = scmp.ne.s32.totalorder %s1061_s3, %s1184_s2  ;;  %p1190_p2 = scmp.lt.s32.totalorder %s1184_s2, %s1184_s2 }
 0x2d6   :  { %p1191_p3 = por %p1190_p2, %p1189_p1 }
 0x2d8   :  { %p1192_p4 = pnand %p1191_p3, %p1185_p0 }
 0x345   :  { %v753_v1 = vpop.trf.xlu1 }
 0x349   :  { %v754_v2 = vpop.trf.xlu1 }
 0x34d   :  { %v755_v3 = vpop.trf.xlu1 }
 0x351   :  { %v756_v4 = vpop.trf.xlu1 }
 0x355   :  { %v757_v5 = vpop.trf.xlu1 }
 0x356   :  { %v769_v12 = vadd.f32 %v757_v5, %v753_v1 }
 0x359   :  { %v758_v6 = vpop.trf.xlu1 }
 0x35a   :  { %v770_v14 = vadd.f32 %v758_v6, %v754_v2 }
 0x35d   :  { %v759_v56 = vpop.trf.xlu1 }
 0x35e   :  { %v771_v20 = vadd.f32 %v759_v56, %v755_v3 }
 0x361   :  { %v760_v7 = vpop.trf.xlu1 }
 0x362   :  { %v772_v24 = vadd.f32 %v760_v7, %v756_v4 }
 0x365   :  { %v761_v8 = vpop.trf.xlu1 }
 0x366   :  { %v773_v15 = vadd.f32 %v769_v12, %v761_v8  ;;  %v1104_v12 = vld [vmem:[%s1472_s12] ss:$0 sm:$0xff] }
 0x369   :  { %v762_v9 = vpop.trf.xlu1 }
 0x36a   :  { %v774_v16 = vadd.f32 %v770_v14, %v762_v9 }
 0x36d   :  { %v763_v10 = vpop.trf.xlu1 }
 0x36e   :  { %v775_v25 = vadd.f32 %v771_v20, %v763_v10 }
 0x371   :  { %v764_v11 = vpop.trf.xlu1 }
 0x372   :  { %v776_v27 = vadd.f32 %v772_v24, %v764_v11 }
 0x375   :  { %v765_v13 = vpop.trf.xlu1 }
 0x376   :  { %v777_v17 = vadd.f32 %v773_v15, %v765_v13 }
 0x378   :  { %v781_v21 = vmul.f32 0.25, %v777_v17 }
 0x379   :  { %v766_v18 = vpop.trf.xlu1 }
 0x37a   :  { %v778_v19 = vadd.f32 %v774_v16, %v766_v18 }
 0x37c   :  { %v782_v22 = vmul.f32 0.25, %v778_v19 }
 0x37d   :  { %v767_v23 = vpop.trf.xlu1 }
 0x37e   :  { %v789_v26 = vpack.c.bf16 %v782_v22, %v781_v21  ;;  %v779_v28 = vadd.f32 %v775_v25, %v767_v23 }
 0x380   :  { %1137 = vmatprep.mubr.msk.bf16.mxu1 %vm810_vm3, %v789_v26  ;;  %v783_v31 = vmul.f32 0.25, %v779_v28 }
 0x381   :  { %v768_v29 = vpop.trf.xlu1 }
 0x382   :  { %v780_v30 = vadd.f32 %v776_v27, %v768_v29 }
 0x384   :  { %v784_v32 = vmul.f32 0.25, %v780_v30 }
 0x386   :  { %v790_v33 = vpack.c.bf16 %v784_v32, %v783_v31 }
 0x388   :  { %1138 = vmatmul.mubr.msk.bf16.vlgmr.msra.gmra.mrb[20].mxu1 %vm810_vm3, %v790_v33 }
 0x389   :  { %1161 = vmatprep.mubr.msk.bf16.mxu1 %vm1210_vm4, %v1209_v35  ;;  %1154 = vmatpush3.bf16.msra.mxu1 %v1180_v58 }
 0x38a   :  { %1155 = vmatprep.subr.bf16.mxu1 %v1209_v35 }
 0x38d   :  { %1156 = vmatpush3.bf16.msra.mxu1 %v1181_v59 }
 0x38e   :  { %1157 = vmatprep.subr.bf16.mxu1 %v1209_v35 }
 0x391   :  { %1158 = vmatpush3.bf16.msra.mxu1 %v1182_v60 }
 0x392   :  { %1159 = vmatprep.subr.bf16.mxu1 %v1209_v35 }
 0x395   :  { %1160 = vmatpush3.bf16.msra.mxu1 %v1183_v61 }
 0x45b   :  { %v1139_v40 = vpop.f32.mrb[20].mxu1 }
 0x45c   :  { %v851_v41 = vpop.f32.mrb[21].mxu1  ;;  %v860_v45 = vadd.f32 %v1139_v40, %v1093_v39 }
 0x45d   :  { %v852_v42 = vadd.f32 %v1093_v39, %v851_v41  ;;  %v1140_v43 = vpop.f32.mrb[22].mxu1 }
 0x45e   :  { %v854_v44 = vpop.f32.mrb[23].mxu1  ;;  %v863_v48 = vadd.f32 %v1140_v43, %v1093_v39  ;;  %v868_v50 = vmax.f32 %v860_v45, 0.0 }
 0x45f   :  { %v855_v46 = vadd.f32 %v1093_v39, %v854_v44  ;;  %v866_v47 = vmax.f32 %v852_v42, 0.0 }
 0x460   :  { %v869_v52 = vmax.f32 %v863_v48, 0.0 }
 0x461   :  { %v867_v49 = vmax.f32 %v855_v46, 0.0 }
 0x463   :  { %v870_v51 = vadd.f32 %v867_v49, %v866_v47 }
 0x465   :  { %v871_v53 = vadd.f32 %v870_v51, %v868_v50 }
 0x467   :  { %v872_v54 = vadd.f32 %v871_v53, %v869_v52 }
 0x469   :  { %v873_v55 = vmul.f32 0.25, %v872_v54 }
 0x46b   :  { %v882_v57 = vpack.c.bf16 %v873_v55, %v873_v55 }
 0x46d   :  { %1150 = vmatmul.mubr.msk.bf16.vlgmr.msra.gmra.mrb[24].mxu0 %vm914_vm5, %v882_v57 }
 0x540   :  { %v952_v63 = vpop.f32.mrb[24].mxu0 }
 0x541   :  { %v953_v0 = vadd.f32 %v1098_v62, %v952_v63  ;;  %v1151_v1 = vpop.f32.mrb[25].mxu0 }
 0x542   :  { %v955_v2 = vpop.f32.mrb[26].mxu0 }
 0x543   :  { %v958_v3 = vmax.f32 %v953_v0, 0.0  ;;  %v1152_v4 = vpop.f32.mrb[27].mxu0 }
 0x545   :  { %v960_v5 = vrot.slane %v958_v3, 2  ;;  %v963_v56 = vrot.slane %v958_v3, 4  ;;  %v966_v8 = vrot.slane %v958_v3, 6 }
 0x547   :  { %v962_v6 = vadd.f32 %v960_v5, %v958_v3 }
 0x549   :  { %v965_v7 = vadd.f32 %v963_v56, %v962_v6 }
 0x54b   :  { %v968_v9 = vadd.f32 %v966_v8, %v965_v7 }
 0x54d   :  { %v969_v10 = vmul.f32 0.25, %v968_v9 }
 0x54f   :  { %v978_v11 = vpack.c.bf16 %v969_v10, %v969_v10 }
 0x551   :  { %1162 = vmatmul.mubr.msk.bf16.vlgmr.msra.gmra.mrb[24].mxu1 %vm914_vm5, %v978_v11 }
 0x624   :  { %v1047_v13 = vpop.f32.mrb[24].mxu1 }
 0x625   :  { %v1048_v14 = vadd.f32 %v1104_v12, %v1047_v13  ;;  %v1163_v15 = vpop.f32.mrb[25].mxu1 }
 0x626   :  { %v1050_v16 = vpop.f32.mrb[26].mxu1 }
 0x627   :  { %1053 = vst [vmem:[#allocation2] sm:$0x3] %v1048_v14  ;;  %v1164_v17 = vpop.f32.mrb[27].mxu1 }
 0x628   :  { %1195 = shalt.err (!%p1192_p4)
}
 0x629   :  { %s1196_s12 = scalar_lea.hbm %s1473_s13, 32 }
 0x62a   :  { %p1197_p5 = scmp.ne.s32.totalorder %s1473_s13, %s1196_s12  ;;  %p1200_p6 = scmp.lt.u32.totalorder %s1196_s12, %s1473_s13 }
 0x62c   :  { %p1202_p7 = pnand %p1200_p6, %p1197_p5 }
 0x62e   :  { %1205 = shalt.err (!%p1202_p7)
}
 0x62f   :  { %1063 = dma.vmem_to_hbm [thread:$0]  %s1061_s3, 32, %s1473_s13, [#allocation3]  }
 0x630   :  { %1206 = dma.done.wait [#allocation3], 32  }
 0x631   :  { %1207 = vsyncadd [#allocation3], 4294967264 }
 0x632   :  { %1067 = vsyncpa [#allocation3], 1 }

</bundles_post_ra>
